<compile_context>
chip_gen: v7x
topology: tpu7x:2x2x1
jax: 0.10.0
libtpu: 0.0.40
codegen_flags: <defaults>
</compile_context>

<pallas_src>
import functools

import jax
import jax.numpy as jnp
from jax import lax
from jax.experimental import pallas as pl
from jax.experimental.pallas import tpu as pltpu


def lstm_fc_kernel(x_ref, wih_ref, whh_ref, b_ref, wfc_ref, bfc_ref,
                   out_ref, gates_scr, h_scr, c_scr,
                   *, t_chunk, tail, unroll):
    """One grid step = one (batch-block, time-chunk) tile of the LSTM.

    x_ref:     (t_chunk, Bb, I)  time-major input slab for this tile
    wih_ref:   (I, 4H)   W_ih^T      (g-gate columns pre-scaled by 2)
    whh_ref:   (H, 4H)   W_hh^T      (g-gate columns pre-scaled by 2)
    b_ref:     (1, 4H)   b_ih + b_hh (g-gate lanes pre-scaled by 2)
    wfc_ref:   (H, O)    W_fc^T
    bfc_ref:   (1, O)    b_fc
    out_ref:   (Bb, O)   FC output (written on the last time chunk only)
    gates_scr: (t_chunk, Bb, 4H)  time-major staging of x @ W_ih^T + bias
    h_scr, c_scr: (Bb, H) recurrent state, persistent across time chunks
    """
    Bb, H = h_scr.shape
    I = x_ref.shape[-1]
    chunk = pl.program_id(1)
    last_chunk = pl.num_programs(1) - 1

    @pl.when(chunk == 0)
    def _init():
        h_scr[...] = jnp.zeros_like(h_scr)
        c_scr[...] = jnp.zeros_like(c_scr)

    # ---- Hoisted input projection, staged time-major in VMEM scratch -------
    # gates_scr[s, b, :] = x[s, b, :] @ W_ih^T + (b_ih + b_hh)
    # (For a partial tail chunk the rows >= tail hold padded garbage; they are
    #  never consumed because the tail loop below runs only `tail` steps.)
    x_blk = x_ref[...].astype(jnp.float32)               # (t_chunk, Bb, I)
    bias = b_ref[...][None, :, :]                         # (1, 1, 4H)
    if I < 8:
        # Tiny feature dim (input_size == 1 in the module): a K<8 MXU dot is
        # degenerate, so do the projection as fused VPU broadcast mul-adds.
        acc = x_blk[:, :, 0:1] * wih_ref[0:1, :][None, :, :]
        for i in range(1, I):
            acc = acc + x_blk[:, :, i:i + 1] * wih_ref[i:i + 1, :][None, :, :]
        gates_scr[...] = acc + bias
    else:
        gates_scr[...] = lax.dot_general(
            x_blk, wih_ref[...],
            dimension_numbers=(((2,), (0,)), ((), ())),
            preferred_element_type=jnp.float32) + bias

    # ---- Serial recurrence over the chunk -----------------------------------
    def step(s, carry):
        # Only the unavoidable h @ W_hh dependency sits on the critical path.
        gates = gates_scr[s] + jnp.dot(
            h_scr[...], whh_ref[...], preferred_element_type=jnp.float32)
        # Single sigmoid over the whole (Bb, 4H) tile; g-gate lanes were
        # pre-scaled by 2, so tanh(g) == 2 * sigmoid(2g) - 1.
        sg = jax.nn.sigmoid(gates)
        i_g = sg[:, 0 * H:1 * H]          # PyTorch gate order: i, f, g, o
        f_g = sg[:, 1 * H:2 * H]
        g_g = 2.0 * sg[:, 2 * H:3 * H] - 1.0
        o_g = sg[:, 3 * H:4 * H]
        c_new = f_g * c_scr[...] + i_g * g_g
        c_scr[...] = c_new
        h_scr[...] = o_g * jnp.tanh(c_new)
        return carry

    def run_steps(n):
        lax.fori_loop(0, n, step, 0, unroll=min(unroll, n))

    if tail == t_chunk:
        run_steps(t_chunk)                 # every chunk is full — no masking
    else:
        # Mask hoisted to chunk granularity: one branch per chunk, both loops
        # have static trip counts.
        @pl.when(chunk != last_chunk)
        def _full():
            run_steps(t_chunk)

        @pl.when(chunk == last_chunk)
        def _partial():
            run_steps(tail)

    # ---- Final FC on the last hidden state (== lstm_out[:, -1, :]) ----------
    @pl.when(chunk == last_chunk)
    def _finish():
        out_ref[...] = (jnp.dot(h_scr[...], wfc_ref[...],
                                preferred_element_type=jnp.float32)
                        + bfc_ref[...]).astype(out_ref.dtype)


def _round_up(x, m):
    return ((x + m - 1) // m) * m


@jax.jit
def music_gen_lstm_forward(x, params):
    """x: (B, T, I) float32, batch_first — same layout as the PyTorch module."""
    B, T, I = x.shape
    H = params["w_hh"].shape[1]
    O = params["w_fc"].shape[0]
    four_h = 4 * H

    # --- static tiling decisions (shapes are static under jit) --------------
    t_chunk = T if T <= 64 else 64               # bounded unroll / VMEM
    num_chunks = -(-T // t_chunk)
    tail = T - (num_chunks - 1) * t_chunk        # length of the last chunk

    Bp = _round_up(B, 8)                         # fill sublanes / MXU M-dim
    Bb = Bp if Bp <= 128 else 128                # batch block (megacore shard)
    Bp = _round_up(Bp, Bb)
    nb = Bp // Bb

    # --- weights: pre-transposed; g-gate columns pre-scaled by 2 so a single
    # whole-tile sigmoid yields tanh(g) via 2*sig - 1 -------------------------
    g_scale = jnp.concatenate([
        jnp.ones((2 * H,), jnp.float32),
        jnp.full((H,), 2.0, jnp.float32),
        jnp.ones((H,), jnp.float32)])
    wih = params["w_ih"].T.astype(jnp.float32) * g_scale[None, :]   # (I, 4H)
    whh = params["w_hh"].T.astype(jnp.float32) * g_scale[None, :]   # (H, 4H)
    b = ((params["b_ih"] + params["b_hh"]).astype(jnp.float32)
         * g_scale).reshape(1, four_h)
    wfc = params["w_fc"].T.astype(jnp.float32)                      # (H, O)
    bfc = params["b_fc"].reshape(1, O).astype(jnp.float32)

    # --- time-major, batch-padded input (one XLA transpose in the wrapper, no
    # per-chunk in-kernel relayout; padded rows are dropped after the kernel) -
    x_tm = jnp.transpose(x.astype(jnp.float32), (1, 0, 2))          # (T, B, I)
    if Bp != B:
        x_tm = jnp.pad(x_tm, ((0, 0), (0, Bp - B), (0, 0)))

    kernel = functools.partial(lstm_fc_kernel, t_chunk=t_chunk, tail=tail,
                               unroll=8)

    # Crude VMEM budget: double-buffered inputs + scratch, with headroom,
    # capped below v7x's 64 MiB physical VMEM.
    est = 4 * (2 * (t_chunk * Bb * I + I * four_h + H * four_h + four_h
                    + H * O + O)
               + t_chunk * Bb * four_h + 2 * Bb * H + Bb * O)
    vmem_limit = int(min(60 * 1024 * 1024, max(32 * 1024 * 1024, 2 * est)))

    out = pl.pallas_call(
        kernel,
        out_shape=jax.ShapeDtypeStruct((Bp, O), jnp.float32),
        grid_spec=pltpu.PrefetchScalarGridSpec(
            num_scalar_prefetch=0,
            grid=(nb, num_chunks),
            in_specs=[
                # x consumed time-major; grid tiles (batch block, time chunk),
                # only a (t_chunk, Bb, I) slab is resident and Pallas
                # double-buffers its DMA across chunks.
                pl.BlockSpec((t_chunk, Bb, I), lambda b, t: (t, b, 0)),
                pl.BlockSpec((I, four_h), lambda b, t: (0, 0)),
                pl.BlockSpec((H, four_h), lambda b, t: (0, 0)),
                pl.BlockSpec((1, four_h), lambda b, t: (0, 0)),
                pl.BlockSpec((H, O), lambda b, t: (0, 0)),
                pl.BlockSpec((1, O), lambda b, t: (0, 0)),
            ],
            out_specs=pl.BlockSpec((Bb, O), lambda b, t: (b, 0)),
            scratch_shapes=[
                pltpu.VMEM((t_chunk, Bb, four_h), jnp.float32),  # staged gates
                pltpu.VMEM((Bb, H), jnp.float32),                # h_t
                pltpu.VMEM((Bb, H), jnp.float32),                # c_t
            ],
        ),
        compiler_params=pltpu.CompilerParams(
            # Batch axis parallel (v7x megacore sharding); time axis is the
            # serial recurrence.
            dimension_semantics=("parallel", "arbitrary"),
            vmem_limit_bytes=vmem_limit),
    )(x_tm, wih, whh, b, wfc, bfc)

    return out[:B]


def init_params(key, input_size, hidden_size, output_size):
    """Deterministic, PyTorch-style uniform(-1/sqrt(H), 1/sqrt(H)) init."""
    ks = jax.random.split(key, 6)
    bound = 1.0 / jnp.sqrt(hidden_size)
    u = lambda k, shape: jax.random.uniform(k, shape, jnp.float32, -bound, bound)
    return {
        "w_ih": u(ks[0], (4 * hidden_size, input_size)),
        "w_hh": u(ks[1], (4 * hidden_size, hidden_size)),
        "b_ih": u(ks[2], (4 * hidden_size,)),
        "b_hh": u(ks[3], (4 * hidden_size,)),
        "w_fc": u(ks[4], (output_size, hidden_size)),
        "b_fc": u(ks[5], (output_size,)),
    }


def reference_forward(x, p):
    """Pure-JAX reference matching torch.nn.LSTM + Linear semantics."""
    B, T, I = x.shape
    H = p["w_hh"].shape[1]
    h = jnp.zeros((B, H), jnp.float32)
    c = jnp.zeros((B, H), jnp.float32)
    for t in range(T):
        gates = (x[:, t, :] @ p["w_ih"].T + p["b_ih"]
                 + h @ p["w_hh"].T + p["b_hh"])
        i = jax.nn.sigmoid(gates[:, 0 * H:1 * H])
        f = jax.nn.sigmoid(gates[:, 1 * H:2 * H])
        g = jnp.tanh(gates[:, 2 * H:3 * H])
        o = jax.nn.sigmoid(gates[:, 3 * H:4 * H])
        c = f * c + i * g
        h = o * jnp.tanh(c)
    return h @ p["w_fc"].T + p["b_fc"]


if __name__ == "__main__":
    # Small shapes consistent with the module's forward:
    # x: (batch=2, seq=8, input_size=1), hidden=32, output classes=16.
    B, T, I = 2, 8, 1
    H, O = 32, 16

    key = jax.random.PRNGKey(0)
    k_params, k_x = jax.random.split(key)
    params = init_params(k_params, I, H, O)
    x = jax.random.normal(k_x, (B, T, I), jnp.float32)

    out = jax.block_until_ready(music_gen_lstm_forward(x, params))
    ref = reference_forward(x, params)

    assert out.shape == (B, O), out.shape
    assert jnp.allclose(out, ref, atol=1e-4, rtol=1e-4), (
        "max abs err = %f" % float(jnp.max(jnp.abs(out - ref))))

    print("KERNEL_OK")
</pallas_src>

<mosaic_0001>
module attributes {stable_mosaic.version = 11 : i64} {
  func.func @lstm_fc_kernel(%arg0: i32, %arg1: i32, %arg2: memref<8x8x1xf32, #tpu.memory_space<vmem>>, %arg3: memref<1x128xf32, #tpu.memory_space<vmem>>, %arg4: memref<32x128xf32, #tpu.memory_space<vmem>>, %arg5: memref<1x128xf32, #tpu.memory_space<vmem>>, %arg6: memref<32x16xf32, #tpu.memory_space<vmem>>, %arg7: memref<1x16xf32, #tpu.memory_space<vmem>>, %arg8: memref<8x16xf32, #tpu.memory_space<vmem>>, %arg9: memref<8x8x128xf32, #tpu.memory_space<vmem>>, %arg10: memref<8x32xf32, #tpu.memory_space<vmem>>, %arg11: memref<8x32xf32, #tpu.memory_space<vmem>>) attributes {dimension_semantics = [#tpu.dimension_semantics<parallel>, #tpu.dimension_semantics<arbitrary>], iteration_bounds = array<i64: 1, 1>, scalar_prefetch = 0 : i64, scratch_operands = 3 : i64, tpu.core_type = #tpu.core_type<tc>, window_params = [{transform_indices = @transform_0, window_bounds = array<i64: 8, 8, 1>}, {pipeline_mode = #tpu.pipeline_mode<synchronous>, transform_indices = @transform_1, window_bounds = array<i64: 1, 128>}, {pipeline_mode = #tpu.pipeline_mode<synchronous>, transform_indices = @transform_2, window_bounds = array<i64: 32, 128>}, {pipeline_mode = #tpu.pipeline_mode<synchronous>, transform_indices = @transform_3, window_bounds = array<i64: 1, 128>}, {pipeline_mode = #tpu.pipeline_mode<synchronous>, transform_indices = @transform_4, window_bounds = array<i64: 32, 16>}, {pipeline_mode = #tpu.pipeline_mode<synchronous>, transform_indices = @transform_5, window_bounds = array<i64: 1, 16>}, {transform_indices = @transform_6, window_bounds = array<i64: 8, 16>}]} {
    %c0_i32 = arith.constant 0 : i32
    %0 = arith.cmpi eq, %arg1, %c0_i32 : i32
    %1 = arith.extui %0 : i1 to i32
    %c0_i32_0 = arith.constant 0 : i32
    %2 = arith.cmpi ne, %1, %c0_i32_0 : i32
    scf.if %2 {
      %cst_140 = arith.constant 0.000000e+00 : f32
      %241 = vector.broadcast %cst_140 : f32 to vector<8x32xf32>
      %c0_141 = arith.constant 0 : index
      %c0_142 = arith.constant 0 : index
      %242 = vector.load %arg10[%c0_141, %c0_142] : memref<8x32xf32, #tpu.memory_space<vmem>>, vector<8x32xf32>
      tpu.vector_store %arg10[%c0_141, %c0_142], %241 {strides = array<i32>} : memref<8x32xf32, #tpu.memory_space<vmem>>, vector<8x32xf32>,
      %cst_143 = arith.constant 0.000000e+00 : f32
      %243 = vector.broadcast %cst_143 : f32 to vector<8x32xf32>
      %c0_144 = arith.constant 0 : index
      %c0_145 = arith.constant 0 : index
      %244 = vector.load %arg11[%c0_144, %c0_145] : memref<8x32xf32, #tpu.memory_space<vmem>>, vector<8x32xf32>
      tpu.vector_store %arg11[%c0_144, %c0_145], %243 {strides = array<i32>} : memref<8x32xf32, #tpu.memory_space<vmem>>, vector<8x32xf32>,
    } else {
    }
    %c0 = arith.constant 0 : index
    %c0_1 = arith.constant 0 : index
    %c0_2 = arith.constant 0 : index
    %3 = vector.load %arg2[%c0, %c0_1, %c0_2] : memref<8x8x1xf32, #tpu.memory_space<vmem>>, vector<8x8x1xf32>
    %c0_3 = arith.constant 0 : index
    %c0_4 = arith.constant 0 : index
    %4 = vector.load %arg5[%c0_3, %c0_4] : memref<1x128xf32, #tpu.memory_space<vmem>>, vector<1x128xf32>
    %5 = vector.shape_cast %4 : vector<1x128xf32> to vector<1x1x128xf32>
    %c0_5 = arith.constant 0 : index
    %c0_6 = arith.constant 0 : index
    %6 = vector.load %arg3[%c0_5, %c0_6] : memref<1x128xf32, #tpu.memory_space<vmem>>, vector<1x128xf32>
    %7 = vector.shape_cast %6 : vector<1x128xf32> to vector<1x1x128xf32>
    %8 = vector.broadcast %3 : vector<8x8x1xf32> to vector<8x8x128xf32>
    %9 = vector.broadcast %7 : vector<1x1x128xf32> to vector<8x8x128xf32>
    %10 = arith.mulf %8, %9 : vector<8x8x128xf32>
    %11 = vector.broadcast %5 : vector<1x1x128xf32> to vector<8x8x128xf32>
    %12 = arith.addf %10, %11 : vector<8x8x128xf32>
    %c0_7 = arith.constant 0 : index
    %c0_8 = arith.constant 0 : index
    %c0_9 = arith.constant 0 : index
    %13 = vector.load %arg9[%c0_7, %c0_8, %c0_9] : memref<8x8x128xf32, #tpu.memory_space<vmem>>, vector<8x8x128xf32>
    tpu.vector_store %arg9[%c0_7, %c0_8, %c0_9], %12 {strides = array<i32>} : memref<8x8x128xf32, #tpu.memory_space<vmem>>, vector<8x8x128xf32>,
    %c0_i32_10 = arith.constant 0 : i32
    %14 = arith.index_cast %c0_i32_10 : i32 to index
    %c0_11 = arith.constant 0 : index
    %c0_12 = arith.constant 0 : index
    %15 = vector.load %arg9[%14, %c0_11, %c0_12] : memref<8x8x128xf32, #tpu.memory_space<vmem>>, vector<1x8x128xf32>
    %16 = vector.shape_cast %15 : vector<1x8x128xf32> to vector<8x128xf32>
    %c0_13 = arith.constant 0 : index
    %c0_14 = arith.constant 0 : index
    %17 = vector.load %arg10[%c0_13, %c0_14] : memref<8x32xf32, #tpu.memory_space<vmem>>, vector<8x32xf32>
    %c0_15 = arith.constant 0 : index
    %c0_16 = arith.constant 0 : index
    %18 = vector.load %arg4[%c0_15, %c0_16] : memref<32x128xf32, #tpu.memory_space<vmem>>, vector<32x128xf32>
    %cst = arith.constant dense<0.000000e+00> : vector<8x128xf32>
    %19 = tpu.matmul %17, %18, %cst {dimension_numbers = #tpu.dot_dimension_numbers<[1], [0], [0], [1], [0, 0, 1, 1], [], []>} : vector<8x32xf32>, vector<32x128xf32>, vector<8x128xf32> -> vector<8x128xf32>
    %20 = arith.addf %16, %19 : vector<8x128xf32>
    %21 = arith.negf %20 : vector<8x128xf32>
    %22 = math.exp %21 : vector<8x128xf32>
    %cst_17 = arith.constant 1.000000e+00 : f32
    %23 = vector.broadcast %cst_17 : f32 to vector<8x128xf32>
    %24 = arith.addf %23, %22 : vector<8x128xf32>
    %25 = arith.divf %23, %24 : vector<8x128xf32>
    %26 = vector.extract_strided_slice %25 {offsets = [0, 0], sizes = [8, 32], strides = [1, 1]} : vector<8x128xf32> to vector<8x32xf32>
    %27 = vector.extract_strided_slice %25 {offsets = [0, 32], sizes = [8, 32], strides = [1, 1]} : vector<8x128xf32> to vector<8x32xf32>
    %28 = vector.extract_strided_slice %25 {offsets = [0, 64], sizes = [8, 32], strides = [1, 1]} : vector<8x128xf32> to vector<8x32xf32>
    %cst_18 = arith.constant 2.000000e+00 : f32
    %29 = vector.broadcast %cst_18 : f32 to vector<8x32xf32>
    %30 = arith.mulf %29, %28 : vector<8x32xf32>
    %cst_19 = arith.constant 1.000000e+00 : f32
    %31 = vector.broadcast %cst_19 : f32 to vector<8x32xf32>
    %32 = arith.subf %30, %31 : vector<8x32xf32>
    %33 = vector.extract_strided_slice %25 {offsets = [0, 96], sizes = [8, 32], strides = [1, 1]} : vector<8x128xf32> to vector<8x32xf32>
    %c0_20 = arith.constant 0 : index
    %c0_21 = arith.constant 0 : index
    %34 = vector.load %arg11[%c0_20, %c0_21] : memref<8x32xf32, #tpu.memory_space<vmem>>, vector<8x32xf32>
    %35 = arith.mulf %27, %34 : vector<8x32xf32>
    %36 = arith.mulf %26, %32 : vector<8x32xf32>
    %37 = arith.addf %35, %36 : vector<8x32xf32>
    %c0_22 = arith.constant 0 : index
    %c0_23 = arith.constant 0 : index
    %38 = vector.load %arg11[%c0_22, %c0_23] : memref<8x32xf32, #tpu.memory_space<vmem>>, vector<8x32xf32>
    tpu.vector_store %arg11[%c0_22, %c0_23], %37 {strides = array<i32>} : memref<8x32xf32, #tpu.memory_space<vmem>>, vector<8x32xf32>,
    %39 = math.tanh %37 : vector<8x32xf32>
    %40 = arith.mulf %33, %39 : vector<8x32xf32>
    %c0_24 = arith.constant 0 : index
    %c0_25 = arith.constant 0 : index
    %41 = vector.load %arg10[%c0_24, %c0_25] : memref<8x32xf32, #tpu.memory_space<vmem>>, vector<8x32xf32>
    tpu.vector_store %arg10[%c0_24, %c0_25], %40 {strides = array<i32>} : memref<8x32xf32, #tpu.memory_space<vmem>>, vector<8x32xf32>,
    %c1_i32 = arith.constant 1 : i32
    %42 = arith.index_cast %c1_i32 : i32 to index
    %c0_26 = arith.constant 0 : index
    %c0_27 = arith.constant 0 : index
    %43 = vector.load %arg9[%42, %c0_26, %c0_27] : memref<8x8x128xf32, #tpu.memory_space<vmem>>, vector<1x8x128xf32>
    %44 = vector.shape_cast %43 : vector<1x8x128xf32> to vector<8x128xf32>
    %c0_28 = arith.constant 0 : index
    %c0_29 = arith.constant 0 : index
    %45 = vector.load %arg10[%c0_28, %c0_29] : memref<8x32xf32, #tpu.memory_space<vmem>>, vector<8x32xf32>
    %c0_30 = arith.constant 0 : index
    %c0_31 = arith.constant 0 : index
    %46 = vector.load %arg4[%c0_30, %c0_31] : memref<32x128xf32, #tpu.memory_space<vmem>>, vector<32x128xf32>
    %cst_32 = arith.constant dense<0.000000e+00> : vector<8x128xf32>
    %47 = tpu.matmul %45, %46, %cst_32 {dimension_numbers = #tpu.dot_dimension_numbers<[1], [0], [0], [1], [0, 0, 1, 1], [], []>} : vector<8x32xf32>, vector<32x128xf32>, vector<8x128xf32> -> vector<8x128xf32>
    %48 = arith.addf %44, %47 : vector<8x128xf32>
    %49 = arith.negf %48 : vector<8x128xf32>
    %50 = math.exp %49 : vector<8x128xf32>
    %cst_33 = arith.constant 1.000000e+00 : f32
    %51 = vector.broadcast %cst_33 : f32 to vector<8x128xf32>
    %52 = arith.addf %51, %50 : vector<8x128xf32>
    %53 = arith.divf %51, %52 : vector<8x128xf32>
    %54 = vector.extract_strided_slice %53 {offsets = [0, 0], sizes = [8, 32], strides = [1, 1]} : vector<8x128xf32> to vector<8x32xf32>
    %55 = vector.extract_strided_slice %53 {offsets = [0, 32], sizes = [8, 32], strides = [1, 1]} : vector<8x128xf32> to vector<8x32xf32>
    %56 = vector.extract_strided_slice %53 {offsets = [0, 64], sizes = [8, 32], strides = [1, 1]} : vector<8x128xf32> to vector<8x32xf32>
    %cst_34 = arith.constant 2.000000e+00 : f32
    %57 = vector.broadcast %cst_34 : f32 to vector<8x32xf32>
    %58 = arith.mulf %57, %56 : vector<8x32xf32>
    %cst_35 = arith.constant 1.000000e+00 : f32
    %59 = vector.broadcast %cst_35 : f32 to vector<8x32xf32>
    %60 = arith.subf %58, %59 : vector<8x32xf32>
    %61 = vector.extract_strided_slice %53 {offsets = [0, 96], sizes = [8, 32], strides = [1, 1]} : vector<8x128xf32> to vector<8x32xf32>
    %c0_36 = arith.constant 0 : index
    %c0_37 = arith.constant 0 : index
    %62 = vector.load %arg11[%c0_36, %c0_37] : memref<8x32xf32, #tpu.memory_space<vmem>>, vector<8x32xf32>
    %63 = arith.mulf %55, %62 : vector<8x32xf32>
    %64 = arith.mulf %54, %60 : vector<8x32xf32>
    %65 = arith.addf %63, %64 : vector<8x32xf32>
    %c0_38 = arith.constant 0 : index
    %c0_39 = arith.constant 0 : index
    %66 = vector.load %arg11[%c0_38, %c0_39] : memref<8x32xf32, #tpu.memory_space<vmem>>, vector<8x32xf32>
    tpu.vector_store %arg11[%c0_38, %c0_39], %65 {strides = array<i32>} : memref<8x32xf32, #tpu.memory_space<vmem>>, vector<8x32xf32>,
    %67 = math.tanh %65 : vector<8x32xf32>
    %68 = arith.mulf %61, %67 : vector<8x32xf32>
    %c0_40 = arith.constant 0 : index
    %c0_41 = arith.constant 0 : index
    %69 = vector.load %arg10[%c0_40, %c0_41] : memref<8x32xf32, #tpu.memory_space<vmem>>, vector<8x32xf32>
    tpu.vector_store %arg10[%c0_40, %c0_41], %68 {strides = array<i32>} : memref<8x32xf32, #tpu.memory_space<vmem>>, vector<8x32xf32>,
    %c2_i32 = arith.constant 2 : i32
    %70 = arith.index_cast %c2_i32 : i32 to index
    %c0_42 = arith.constant 0 : index
    %c0_43 = arith.constant 0 : index
    %71 = vector.load %arg9[%70, %c0_42, %c0_43] : memref<8x8x128xf32, #tpu.memory_space<vmem>>, vector<1x8x128xf32>
    %72 = vector.shape_cast %71 : vector<1x8x128xf32> to vector<8x128xf32>
    %c0_44 = arith.constant 0 : index
    %c0_45 = arith.constant 0 : index
    %73 = vector.load %arg10[%c0_44, %c0_45] : memref<8x32xf32, #tpu.memory_space<vmem>>, vector<8x32xf32>
    %c0_46 = arith.constant 0 : index
    %c0_47 = arith.constant 0 : index
    %74 = vector.load %arg4[%c0_46, %c0_47] : memref<32x128xf32, #tpu.memory_space<vmem>>, vector<32x128xf32>
    %cst_48 = arith.constant dense<0.000000e+00> : vector<8x128xf32>
    %75 = tpu.matmul %73, %74, %cst_48 {dimension_numbers = #tpu.dot_dimension_numbers<[1], [0], [0], [1], [0, 0, 1, 1], [], []>} : vector<8x32xf32>, vector<32x128xf32>, vector<8x128xf32> -> vector<8x128xf32>
    %76 = arith.addf %72, %75 : vector<8x128xf32>
    %77 = arith.negf %76 : vector<8x128xf32>
    %78 = math.exp %77 : vector<8x128xf32>
    %cst_49 = arith.constant 1.000000e+00 : f32
    %79 = vector.broadcast %cst_49 : f32 to vector<8x128xf32>
    %80 = arith.addf %79, %78 : vector<8x128xf32>
    %81 = arith.divf %79, %80 : vector<8x128xf32>
    %82 = vector.extract_strided_slice %81 {offsets = [0, 0], sizes = [8, 32], strides = [1, 1]} : vector<8x128xf32> to vector<8x32xf32>
    %83 = vector.extract_strided_slice %81 {offsets = [0, 32], sizes = [8, 32], strides = [1, 1]} : vector<8x128xf32> to vector<8x32xf32>
    %84 = vector.extract_strided_slice %81 {offsets = [0, 64], sizes = [8, 32], strides = [1, 1]} : vector<8x128xf32> to vector<8x32xf32>
    %cst_50 = arith.constant 2.000000e+00 : f32
    %85 = vector.broadcast %cst_50 : f32 to vector<8x32xf32>
    %86 = arith.mulf %85, %84 : vector<8x32xf32>
    %cst_51 = arith.constant 1.000000e+00 : f32
    %87 = vector.broadcast %cst_51 : f32 to vector<8x32xf32>
    %88 = arith.subf %86, %87 : vector<8x32xf32>
    %89 = vector.extract_strided_slice %81 {offsets = [0, 96], sizes = [8, 32], strides = [1, 1]} : vector<8x128xf32> to vector<8x32xf32>
    %c0_52 = arith.constant 0 : index
    %c0_53 = arith.constant 0 : index
    %90 = vector.load %arg11[%c0_52, %c0_53] : memref<8x32xf32, #tpu.memory_space<vmem>>, vector<8x32xf32>
    %91 = arith.mulf %83, %90 : vector<8x32xf32>
    %92 = arith.mulf %82, %88 : vector<8x32xf32>
    %93 = arith.addf %91, %92 : vector<8x32xf32>
    %c0_54 = arith.constant 0 : index
    %c0_55 = arith.constant 0 : index
    %94 = vector.load %arg11[%c0_54, %c0_55] : memref<8x32xf32, #tpu.memory_space<vmem>>, vector<8x32xf32>
    tpu.vector_store %arg11[%c0_54, %c0_55], %93 {strides = array<i32>} : memref<8x32xf32, #tpu.memory_space<vmem>>, vector<8x32xf32>,
    %95 = math.tanh %93 : vector<8x32xf32>
    %96 = arith.mulf %89, %95 : vector<8x32xf32>
    %c0_56 = arith.constant 0 : index
    %c0_57 = arith.constant 0 : index
    %97 = vector.load %arg10[%c0_56, %c0_57] : memref<8x32xf32, #tpu.memory_space<vmem>>, vector<8x32xf32>
    tpu.vector_store %arg10[%c0_56, %c0_57], %96 {strides = array<i32>} : memref<8x32xf32, #tpu.memory_space<vmem>>, vector<8x32xf32>,
    %c3_i32 = arith.constant 3 : i32
    %98 = arith.index_cast %c3_i32 : i32 to index
    %c0_58 = arith.constant 0 : index
    %c0_59 = arith.constant 0 : index
    %99 = vector.load %arg9[%98, %c0_58, %c0_59] : memref<8x8x128xf32, #tpu.memory_space<vmem>>, vector<1x8x128xf32>
    %100 = vector.shape_cast %99 : vector<1x8x128xf32> to vector<8x128xf32>
    %c0_60 = arith.constant 0 : index
    %c0_61 = arith.constant 0 : index
    %101 = vector.load %arg10[%c0_60, %c0_61] : memref<8x32xf32, #tpu.memory_space<vmem>>, vector<8x32xf32>
    %c0_62 = arith.constant 0 : index
    %c0_63 = arith.constant 0 : index
    %102 = vector.load %arg4[%c0_62, %c0_63] : memref<32x128xf32, #tpu.memory_space<vmem>>, vector<32x128xf32>
    %cst_64 = arith.constant dense<0.000000e+00> : vector<8x128xf32>
    %103 = tpu.matmul %101, %102, %cst_64 {dimension_numbers = #tpu.dot_dimension_numbers<[1], [0], [0], [1], [0, 0, 1, 1], [], []>} : vector<8x32xf32>, vector<32x128xf32>, vector<8x128xf32> -> vector<8x128xf32>
    %104 = arith.addf %100, %103 : vector<8x128xf32>
    %105 = arith.negf %104 : vector<8x128xf32>
    %106 = math.exp %105 : vector<8x128xf32>
    %cst_65 = arith.constant 1.000000e+00 : f32
    %107 = vector.broadcast %cst_65 : f32 to vector<8x128xf32>
    %108 = arith.addf %107, %106 : vector<8x128xf32>
    %109 = arith.divf %107, %108 : vector<8x128xf32>
    %110 = vector.extract_strided_slice %109 {offsets = [0, 0], sizes = [8, 32], strides = [1, 1]} : vector<8x128xf32> to vector<8x32xf32>
    %111 = vector.extract_strided_slice %109 {offsets = [0, 32], sizes = [8, 32], strides = [1, 1]} : vector<8x128xf32> to vector<8x32xf32>
    %112 = vector.extract_strided_slice %109 {offsets = [0, 64], sizes = [8, 32], strides = [1, 1]} : vector<8x128xf32> to vector<8x32xf32>
    %cst_66 = arith.constant 2.000000e+00 : f32
    %113 = vector.broadcast %cst_66 : f32 to vector<8x32xf32>
    %114 = arith.mulf %113, %112 : vector<8x32xf32>
    %cst_67 = arith.constant 1.000000e+00 : f32
    %115 = vector.broadcast %cst_67 : f32 to vector<8x32xf32>
    %116 = arith.subf %114, %115 : vector<8x32xf32>
    %117 = vector.extract_strided_slice %109 {offsets = [0, 96], sizes = [8, 32], strides = [1, 1]} : vector<8x128xf32> to vector<8x32xf32>
    %c0_68 = arith.constant 0 : index
    %c0_69 = arith.constant 0 : index
    %118 = vector.load %arg11[%c0_68, %c0_69] : memref<8x32xf32, #tpu.memory_space<vmem>>, vector<8x32xf32>
    %119 = arith.mulf %111, %118 : vector<8x32xf32>
    %120 = arith.mulf %110, %116 : vector<8x32xf32>
    %121 = arith.addf %119, %120 : vector<8x32xf32>
    %c0_70 = arith.constant 0 : index
    %c0_71 = arith.constant 0 : index
    %122 = vector.load %arg11[%c0_70, %c0_71] : memref<8x32xf32, #tpu.memory_space<vmem>>, vector<8x32xf32>
    tpu.vector_store %arg11[%c0_70, %c0_71], %121 {strides = array<i32>} : memref<8x32xf32, #tpu.memory_space<vmem>>, vector<8x32xf32>,
    %123 = math.tanh %121 : vector<8x32xf32>
    %124 = arith.mulf %117, %123 : vector<8x32xf32>
    %c0_72 = arith.constant 0 : index
    %c0_73 = arith.constant 0 : index
    %125 = vector.load %arg10[%c0_72, %c0_73] : memref<8x32xf32, #tpu.memory_space<vmem>>, vector<8x32xf32>
    tpu.vector_store %arg10[%c0_72, %c0_73], %124 {strides = array<i32>} : memref<8x32xf32, #tpu.memory_space<vmem>>, vector<8x32xf32>,
    %c4_i32 = arith.constant 4 : i32
    %126 = arith.index_cast %c4_i32 : i32 to index
    %c0_74 = arith.constant 0 : index
    %c0_75 = arith.constant 0 : index
    %127 = vector.load %arg9[%126, %c0_74, %c0_75] : memref<8x8x128xf32, #tpu.memory_space<vmem>>, vector<1x8x128xf32>
    %128 = vector.shape_cast %127 : vector<1x8x128xf32> to vector<8x128xf32>
    %c0_76 = arith.constant 0 : index
    %c0_77 = arith.constant 0 : index
    %129 = vector.load %arg10[%c0_76, %c0_77] : memref<8x32xf32, #tpu.memory_space<vmem>>, vector<8x32xf32>
    %c0_78 = arith.constant 0 : index
    %c0_79 = arith.constant 0 : index
    %130 = vector.load %arg4[%c0_78, %c0_79] : memref<32x128xf32, #tpu.memory_space<vmem>>, vector<32x128xf32>
    %cst_80 = arith.constant dense<0.000000e+00> : vector<8x128xf32>
    %131 = tpu.matmul %129, %130, %cst_80 {dimension_numbers = #tpu.dot_dimension_numbers<[1], [0], [0], [1], [0, 0, 1, 1], [], []>} : vector<8x32xf32>, vector<32x128xf32>, vector<8x128xf32> -> vector<8x128xf32>
    %132 = arith.addf %128, %131 : vector<8x128xf32>
    %133 = arith.negf %132 : vector<8x128xf32>
    %134 = math.exp %133 : vector<8x128xf32>
    %cst_81 = arith.constant 1.000000e+00 : f32
    %135 = vector.broadcast %cst_81 : f32 to vector<8x128xf32>
    %136 = arith.addf %135, %134 : vector<8x128xf32>
    %137 = arith.divf %135, %136 : vector<8x128xf32>
    %138 = vector.extract_strided_slice %137 {offsets = [0, 0], sizes = [8, 32], strides = [1, 1]} : vector<8x128xf32> to vector<8x32xf32>
    %139 = vector.extract_strided_slice %137 {offsets = [0, 32], sizes = [8, 32], strides = [1, 1]} : vector<8x128xf32> to vector<8x32xf32>
    %140 = vector.extract_strided_slice %137 {offsets = [0, 64], sizes = [8, 32], strides = [1, 1]} : vector<8x128xf32> to vector<8x32xf32>
    %cst_82 = arith.constant 2.000000e+00 : f32
    %141 = vector.broadcast %cst_82 : f32 to vector<8x32xf32>
    %142 = arith.mulf %141, %140 : vector<8x32xf32>
    %cst_83 = arith.constant 1.000000e+00 : f32
    %143 = vector.broadcast %cst_83 : f32 to vector<8x32xf32>
    %144 = arith.subf %142, %143 : vector<8x32xf32>
    %145 = vector.extract_strided_slice %137 {offsets = [0, 96], sizes = [8, 32], strides = [1, 1]} : vector<8x128xf32> to vector<8x32xf32>
    %c0_84 = arith.constant 0 : index
    %c0_85 = arith.constant 0 : index
    %146 = vector.load %arg11[%c0_84, %c0_85] : memref<8x32xf32, #tpu.memory_space<vmem>>, vector<8x32xf32>
    %147 = arith.mulf %139, %146 : vector<8x32xf32>
    %148 = arith.mulf %138, %144 : vector<8x32xf32>
    %149 = arith.addf %147, %148 : vector<8x32xf32>
    %c0_86 = arith.constant 0 : index
    %c0_87 = arith.constant 0 : index
    %150 = vector.load %arg11[%c0_86, %c0_87] : memref<8x32xf32, #tpu.memory_space<vmem>>, vector<8x32xf32>
    tpu.vector_store %arg11[%c0_86, %c0_87], %149 {strides = array<i32>} : memref<8x32xf32, #tpu.memory_space<vmem>>, vector<8x32xf32>,
    %151 = math.tanh %149 : vector<8x32xf32>
    %152 = arith.mulf %145, %151 : vector<8x32xf32>
    %c0_88 = arith.constant 0 : index
    %c0_89 = arith.constant 0 : index
    %153 = vector.load %arg10[%c0_88, %c0_89] : memref<8x32xf32, #tpu.memory_space<vmem>>, vector<8x32xf32>
    tpu.vector_store %arg10[%c0_88, %c0_89], %152 {strides = array<i32>} : memref<8x32xf32, #tpu.memory_space<vmem>>, vector<8x32xf32>,
    %c5_i32 = arith.constant 5 : i32
    %154 = arith.index_cast %c5_i32 : i32 to index
    %c0_90 = arith.constant 0 : index
    %c0_91 = arith.constant 0 : index
    %155 = vector.load %arg9[%154, %c0_90, %c0_91] : memref<8x8x128xf32, #tpu.memory_space<vmem>>, vector<1x8x128xf32>
    %156 = vector.shape_cast %155 : vector<1x8x128xf32> to vector<8x128xf32>
    %c0_92 = arith.constant 0 : index
    %c0_93 = arith.constant 0 : index
    %157 = vector.load %arg10[%c0_92, %c0_93] : memref<8x32xf32, #tpu.memory_space<vmem>>, vector<8x32xf32>
    %c0_94 = arith.constant 0 : index
    %c0_95 = arith.constant 0 : index
    %158 = vector.load %arg4[%c0_94, %c0_95] : memref<32x128xf32, #tpu.memory_space<vmem>>, vector<32x128xf32>
    %cst_96 = arith.constant dense<0.000000e+00> : vector<8x128xf32>
    %159 = tpu.matmul %157, %158, %cst_96 {dimension_numbers = #tpu.dot_dimension_numbers<[1], [0], [0], [1], [0, 0, 1, 1], [], []>} : vector<8x32xf32>, vector<32x128xf32>, vector<8x128xf32> -> vector<8x128xf32>
    %160 = arith.addf %156, %159 : vector<8x128xf32>
    %161 = arith.negf %160 : vector<8x128xf32>
    %162 = math.exp %161 : vector<8x128xf32>
    %cst_97 = arith.constant 1.000000e+00 : f32
    %163 = vector.broadcast %cst_97 : f32 to vector<8x128xf32>
    %164 = arith.addf %163, %162 : vector<8x128xf32>
    %165 = arith.divf %163, %164 : vector<8x128xf32>
    %166 = vector.extract_strided_slice %165 {offsets = [0, 0], sizes = [8, 32], strides = [1, 1]} : vector<8x128xf32> to vector<8x32xf32>
    %167 = vector.extract_strided_slice %165 {offsets = [0, 32], sizes = [8, 32], strides = [1, 1]} : vector<8x128xf32> to vector<8x32xf32>
    %168 = vector.extract_strided_slice %165 {offsets = [0, 64], sizes = [8, 32], strides = [1, 1]} : vector<8x128xf32> to vector<8x32xf32>
    %cst_98 = arith.constant 2.000000e+00 : f32
    %169 = vector.broadcast %cst_98 : f32 to vector<8x32xf32>
    %170 = arith.mulf %169, %168 : vector<8x32xf32>
    %cst_99 = arith.constant 1.000000e+00 : f32
    %171 = vector.broadcast %cst_99 : f32 to vector<8x32xf32>
    %172 = arith.subf %170, %171 : vector<8x32xf32>
    %173 = vector.extract_strided_slice %165 {offsets = [0, 96], sizes = [8, 32], strides = [1, 1]} : vector<8x128xf32> to vector<8x32xf32>
    %c0_100 = arith.constant 0 : index
    %c0_101 = arith.constant 0 : index
    %174 = vector.load %arg11[%c0_100, %c0_101] : memref<8x32xf32, #tpu.memory_space<vmem>>, vector<8x32xf32>
    %175 = arith.mulf %167, %174 : vector<8x32xf32>
    %176 = arith.mulf %166, %172 : vector<8x32xf32>
    %177 = arith.addf %175, %176 : vector<8x32xf32>
    %c0_102 = arith.constant 0 : index
    %c0_103 = arith.constant 0 : index
    %178 = vector.load %arg11[%c0_102, %c0_103] : memref<8x32xf32, #tpu.memory_space<vmem>>, vector<8x32xf32>
    tpu.vector_store %arg11[%c0_102, %c0_103], %177 {strides = array<i32>} : memref<8x32xf32, #tpu.memory_space<vmem>>, vector<8x32xf32>,
    %179 = math.tanh %177 : vector<8x32xf32>
    %180 = arith.mulf %173, %179 : vector<8x32xf32>
    %c0_104 = arith.constant 0 : index
    %c0_105 = arith.constant 0 : index
    %181 = vector.load %arg10[%c0_104, %c0_105] : memref<8x32xf32, #tpu.memory_space<vmem>>, vector<8x32xf32>
    tpu.vector_store %arg10[%c0_104, %c0_105], %180 {strides = array<i32>} : memref<8x32xf32, #tpu.memory_space<vmem>>, vector<8x32xf32>,
    %c6_i32 = arith.constant 6 : i32
    %182 = arith.index_cast %c6_i32 : i32 to index
    %c0_106 = arith.constant 0 : index
    %c0_107 = arith.constant 0 : index
    %183 = vector.load %arg9[%182, %c0_106, %c0_107] : memref<8x8x128xf32, #tpu.memory_space<vmem>>, vector<1x8x128xf32>
    %184 = vector.shape_cast %183 : vector<1x8x128xf32> to vector<8x128xf32>
    %c0_108 = arith.constant 0 : index
    %c0_109 = arith.constant 0 : index
    %185 = vector.load %arg10[%c0_108, %c0_109] : memref<8x32xf32, #tpu.memory_space<vmem>>, vector<8x32xf32>
    %c0_110 = arith.constant 0 : index
    %c0_111 = arith.constant 0 : index
    %186 = vector.load %arg4[%c0_110, %c0_111] : memref<32x128xf32, #tpu.memory_space<vmem>>, vector<32x128xf32>
    %cst_112 = arith.constant dense<0.000000e+00> : vector<8x128xf32>
    %187 = tpu.matmul %185, %186, %cst_112 {dimension_numbers = #tpu.dot_dimension_numbers<[1], [0], [0], [1], [0, 0, 1, 1], [], []>} : vector<8x32xf32>, vector<32x128xf32>, vector<8x128xf32> -> vector<8x128xf32>
    %188 = arith.addf %184, %187 : vector<8x128xf32>
    %189 = arith.negf %188 : vector<8x128xf32>
    %190 = math.exp %189 : vector<8x128xf32>
    %cst_113 = arith.constant 1.000000e+00 : f32
    %191 = vector.broadcast %cst_113 : f32 to vector<8x128xf32>
    %192 = arith.addf %191, %190 : vector<8x128xf32>
    %193 = arith.divf %191, %192 : vector<8x128xf32>
    %194 = vector.extract_strided_slice %193 {offsets = [0, 0], sizes = [8, 32], strides = [1, 1]} : vector<8x128xf32> to vector<8x32xf32>
    %195 = vector.extract_strided_slice %193 {offsets = [0, 32], sizes = [8, 32], strides = [1, 1]} : vector<8x128xf32> to vector<8x32xf32>
    %196 = vector.extract_strided_slice %193 {offsets = [0, 64], sizes = [8, 32], strides = [1, 1]} : vector<8x128xf32> to vector<8x32xf32>
    %cst_114 = arith.constant 2.000000e+00 : f32
    %197 = vector.broadcast %cst_114 : f32 to vector<8x32xf32>
    %198 = arith.mulf %197, %196 : vector<8x32xf32>
    %cst_115 = arith.constant 1.000000e+00 : f32
    %199 = vector.broadcast %cst_115 : f32 to vector<8x32xf32>
    %200 = arith.subf %198, %199 : vector<8x32xf32>
    %201 = vector.extract_strided_slice %193 {offsets = [0, 96], sizes = [8, 32], strides = [1, 1]} : vector<8x128xf32> to vector<8x32xf32>
    %c0_116 = arith.constant 0 : index
    %c0_117 = arith.constant 0 : index
    %202 = vector.load %arg11[%c0_116, %c0_117] : memref<8x32xf32, #tpu.memory_space<vmem>>, vector<8x32xf32>
    %203 = arith.mulf %195, %202 : vector<8x32xf32>
    %204 = arith.mulf %194, %200 : vector<8x32xf32>
    %205 = arith.addf %203, %204 : vector<8x32xf32>
    %c0_118 = arith.constant 0 : index
    %c0_119 = arith.constant 0 : index
    %206 = vector.load %arg11[%c0_118, %c0_119] : memref<8x32xf32, #tpu.memory_space<vmem>>, vector<8x32xf32>
    tpu.vector_store %arg11[%c0_118, %c0_119], %205 {strides = array<i32>} : memref<8x32xf32, #tpu.memory_space<vmem>>, vector<8x32xf32>,
    %207 = math.tanh %205 : vector<8x32xf32>
    %208 = arith.mulf %201, %207 : vector<8x32xf32>
    %c0_120 = arith.constant 0 : index
    %c0_121 = arith.constant 0 : index
    %209 = vector.load %arg10[%c0_120, %c0_121] : memref<8x32xf32, #tpu.memory_space<vmem>>, vector<8x32xf32>
    tpu.vector_store %arg10[%c0_120, %c0_121], %208 {strides = array<i32>} : memref<8x32xf32, #tpu.memory_space<vmem>>, vector<8x32xf32>,
    %c7_i32 = arith.constant 7 : i32
    %210 = arith.index_cast %c7_i32 : i32 to index
    %c0_122 = arith.constant 0 : index
    %c0_123 = arith.constant 0 : index
    %211 = vector.load %arg9[%210, %c0_122, %c0_123] : memref<8x8x128xf32, #tpu.memory_space<vmem>>, vector<1x8x128xf32>
    %212 = vector.shape_cast %211 : vector<1x8x128xf32> to vector<8x128xf32>
    %c0_124 = arith.constant 0 : index
    %c0_125 = arith.constant 0 : index
    %213 = vector.load %arg10[%c0_124, %c0_125] : memref<8x32xf32, #tpu.memory_space<vmem>>, vector<8x32xf32>
    %c0_126 = arith.constant 0 : index
    %c0_127 = arith.constant 0 : index
    %214 = vector.load %arg4[%c0_126, %c0_127] : memref<32x128xf32, #tpu.memory_space<vmem>>, vector<32x128xf32>
    %cst_128 = arith.constant dense<0.000000e+00> : vector<8x128xf32>
    %215 = tpu.matmul %213, %214, %cst_128 {dimension_numbers = #tpu.dot_dimension_numbers<[1], [0], [0], [1], [0, 0, 1, 1], [], []>} : vector<8x32xf32>, vector<32x128xf32>, vector<8x128xf32> -> vector<8x128xf32>
    %216 = arith.addf %212, %215 : vector<8x128xf32>
    %217 = arith.negf %216 : vector<8x128xf32>
    %218 = math.exp %217 : vector<8x128xf32>
    %cst_129 = arith.constant 1.000000e+00 : f32
    %219 = vector.broadcast %cst_129 : f32 to vector<8x128xf32>
    %220 = arith.addf %219, %218 : vector<8x128xf32>
    %221 = arith.divf %219, %220 : vector<8x128xf32>
    %222 = vector.extract_strided_slice %221 {offsets = [0, 0], sizes = [8, 32], strides = [1, 1]} : vector<8x128xf32> to vector<8x32xf32>
    %223 = vector.extract_strided_slice %221 {offsets = [0, 32], sizes = [8, 32], strides = [1, 1]} : vector<8x128xf32> to vector<8x32xf32>
    %224 = vector.extract_strided_slice %221 {offsets = [0, 64], sizes = [8, 32], strides = [1, 1]} : vector<8x128xf32> to vector<8x32xf32>
    %cst_130 = arith.constant 2.000000e+00 : f32
    %225 = vector.broadcast %cst_130 : f32 to vector<8x32xf32>
    %226 = arith.mulf %225, %224 : vector<8x32xf32>
    %cst_131 = arith.constant 1.000000e+00 : f32
    %227 = vector.broadcast %cst_131 : f32 to vector<8x32xf32>
    %228 = arith.subf %226, %227 : vector<8x32xf32>
    %229 = vector.extract_strided_slice %221 {offsets = [0, 96], sizes = [8, 32], strides = [1, 1]} : vector<8x128xf32> to vector<8x32xf32>
    %c0_132 = arith.constant 0 : index
    %c0_133 = arith.constant 0 : index
    %230 = vector.load %arg11[%c0_132, %c0_133] : memref<8x32xf32, #tpu.memory_space<vmem>>, vector<8x32xf32>
    %231 = arith.mulf %223, %230 : vector<8x32xf32>
    %232 = arith.mulf %222, %228 : vector<8x32xf32>
    %233 = arith.addf %231, %232 : vector<8x32xf32>
    %c0_134 = arith.constant 0 : index
    %c0_135 = arith.constant 0 : index
    %234 = vector.load %arg11[%c0_134, %c0_135] : memref<8x32xf32, #tpu.memory_space<vmem>>, vector<8x32xf32>
    tpu.vector_store %arg11[%c0_134, %c0_135], %233 {strides = array<i32>} : memref<8x32xf32, #tpu.memory_space<vmem>>, vector<8x32xf32>,
    %235 = math.tanh %233 : vector<8x32xf32>
    %236 = arith.mulf %229, %235 : vector<8x32xf32>
    %c0_136 = arith.constant 0 : index
    %c0_137 = arith.constant 0 : index
    %237 = vector.load %arg10[%c0_136, %c0_137] : memref<8x32xf32, #tpu.memory_space<vmem>>, vector<8x32xf32>
    tpu.vector_store %arg10[%c0_136, %c0_137], %236 {strides = array<i32>} : memref<8x32xf32, #tpu.memory_space<vmem>>, vector<8x32xf32>,
    %c8_i32 = arith.constant 8 : i32
    %c0_i32_138 = arith.constant 0 : i32
    %238 = arith.cmpi eq, %arg1, %c0_i32_138 : i32
    %239 = arith.extui %238 : i1 to i32
    %c0_i32_139 = arith.constant 0 : i32
    %240 = arith.cmpi ne, %239, %c0_i32_139 : i32
    scf.if %240 {
      %c0_140 = arith.constant 0 : index
      %c0_141 = arith.constant 0 : index
      %241 = vector.load %arg10[%c0_140, %c0_141] : memref<8x32xf32, #tpu.memory_space<vmem>>, vector<8x32xf32>
      %c0_142 = arith.constant 0 : index
      %c0_143 = arith.constant 0 : index
      %242 = vector.load %arg6[%c0_142, %c0_143] : memref<32x16xf32, #tpu.memory_space<vmem>>, vector<32x16xf32>
      %cst_144 = arith.constant dense<0.000000e+00> : vector<8x16xf32>
      %243 = tpu.matmul %241, %242, %cst_144 {dimension_numbers = #tpu.dot_dimension_numbers<[1], [0], [0], [1], [0, 0, 1, 1], [], []>} : vector<8x32xf32>, vector<32x16xf32>, vector<8x16xf32> -> vector<8x16xf32>
      %c0_145 = arith.constant 0 : index
      %c0_146 = arith.constant 0 : index
      %244 = vector.load %arg7[%c0_145, %c0_146] : memref<1x16xf32, #tpu.memory_space<vmem>>, vector<1x16xf32>
      %245 = vector.broadcast %244 : vector<1x16xf32> to vector<8x16xf32>
      %246 = arith.addf %243, %245 : vector<8x16xf32>
      %c0_147 = arith.constant 0 : index
      %c0_148 = arith.constant 0 : index
      %247 = vector.load %arg8[%c0_147, %c0_148] : memref<8x16xf32, #tpu.memory_space<vmem>>, vector<8x16xf32>
      tpu.vector_store %arg8[%c0_147, %c0_148], %246 {strides = array<i32>} : memref<8x16xf32, #tpu.memory_space<vmem>>, vector<8x16xf32>,
    } else {
    }
    return
  }
  func.func @transform_0(%arg0: i32, %arg1: i32) -> (i32, i32, i32) {
    %c0_i32 = arith.constant 0 : i32
    %c0_i32_0 = arith.constant 0 : i32
    return %arg1, %arg0, %c0_i32 : i32, i32, i32
  }
  func.func @transform_1(%arg0: i32, %arg1: i32) -> (i32, i32) {
    %c0_i32 = arith.constant 0 : i32
    %c0_i32_0 = arith.constant 0 : i32
    %c0_i32_1 = arith.constant 0 : i32
    return %c0_i32, %c0_i32_0 : i32, i32
  }
  func.func @transform_2(%arg0: i32, %arg1: i32) -> (i32, i32) {
    %c0_i32 = arith.constant 0 : i32
    %c0_i32_0 = arith.constant 0 : i32
    %c0_i32_1 = arith.constant 0 : i32
    return %c0_i32, %c0_i32_0 : i32, i32
  }
  func.func @transform_3(%arg0: i32, %arg1: i32) -> (i32, i32) {
    %c0_i32 = arith.constant 0 : i32
    %c0_i32_0 = arith.constant 0 : i32
    %c0_i32_1 = arith.constant 0 : i32
    return %c0_i32, %c0_i32_0 : i32, i32
  }
  func.func @transform_4(%arg0: i32, %arg1: i32) -> (i32, i32) {
    %c0_i32 = arith.constant 0 : i32
    %c0_i32_0 = arith.constant 0 : i32
    %c0_i32_1 = arith.constant 0 : i32
    return %c0_i32, %c0_i32_0 : i32, i32
  }
  func.func @transform_5(%arg0: i32, %arg1: i32) -> (i32, i32) {
    %c0_i32 = arith.constant 0 : i32
    %c0_i32_0 = arith.constant 0 : i32
    %c0_i32_1 = arith.constant 0 : i32
    return %c0_i32, %c0_i32_0 : i32, i32
  }
  func.func @transform_6(%arg0: i32, %arg1: i32) -> (i32, i32) {
    %c0_i32 = arith.constant 0 : i32
    %c0_i32_0 = arith.constant 0 : i32
    return %arg0, %c0_i32 : i32, i32
  }
}

</mosaic_0001>

<bundles_post_ra>
// kernel: music_gen_lstm_forward.1
= control target key start
LH: loop header
LB: loop body
LE: loop exit
PB: predicated region body
PF: predicated region fallthrough
CT: control target
= control target key end

     0   :  { %vm27_vm0 = vcmask 261120   ;;  %v1461_v0 = vmov 0.0|0.0   ;;  %vm1462_vm1 = vmmov 0   ;;  %v1463_v4 = vmov 0.0   ;;  %s1467_s12 = smov 96   ;;  %s1716_s2 = inlined_call_operand.vmem [shape: f32[32,128], index: 2, kind: input, shape index: {}]   ;;  %s1717_s0 = inlined_call_operand.vmem [shape: f32[8,8,1], index: 0, kind: input, shape index: {}]   ;;  %s1718_s1 = inlined_call_operand.vmem [shape: f32[1,128], index: 1, kind: input, shape index: {}]   ;;  %s1719_s3 = inlined_call_operand.vmem [shape: f32[1,128], index: 3, kind: input, shape index: {}]   ;;  %s1720_s4 = inlined_call_operand.vmem [shape: f32[32,16], index: 4, kind: input, shape index: {}]   ;;  %s1721_s5 = inlined_call_operand.vmem [shape: f32[1,16], index: 5, kind: input, shape index: {}]   ;;  %s1722_s6 = inlined_call_operand.vmem [shape: f32[8,16], index: 6, kind: output, shape index: {}]  }
   0x1   :  { %1350 = vmatprep.subr.bf16.mxu0 %v1461_v0  ;;  %v118_v1 = vld [vmem:[%s1716_s2] sm:$0xff]  ;;  %v119_v2 = vld [vmem:[%s1716_s2 + $0x8] sm:$0xff]  ;;  %v120_v3 = vld [vmem:[%s1716_s2 + $0x10] sm:$0xff]  ;;  %1259 = vmatprep.mubr.msk.f32.mxu0 %vm1462_vm1, %v1463_v4  ;;  %28 = vst.msk [vmem:[#allocation3] sm:$0xff] %vm27_vm0, %v1463_v4  ;;  %v1464_v7 = vmov 0   ;;  %vm1172_vm2 = vcmask 130048  }
   0x2   :  { %29 = vst.msk [vmem:[#allocation4] sm:$0xff] %vm27_vm0, %v1463_v4  ;;  %v1519_v5 = vpack.c.bf16 %v119_v2, %v118_v1  ;;  %v121_v6 = vld [vmem:[%s1716_s2 + $0x18] sm:$0xff]  ;;  %1411 = vset.pattern.permute.xlu0 %v1464_v7  ;;  %v30_v8 = vld [vmem:[%s1717_s0] sm:$0xff]  ;;  %1356 = vmatprep.subr.bf16.mxu1 %v1461_v0  ;;  %s1465_s2 = smov 32   ;;  %v31_v33 = vld [vmem:[%s1717_s0 + $0x8] sm:$0xff] }
   0x3   :  { %42 = vperm.xlu0 %1411, %v30_v8   ;;  %1270 = vmatprep.mubr.msk.f32.mxu1 %vm1462_vm1, %v1463_v4  ;;  %v1531_v9 = vpack.c.bf16 %v121_v6, %v120_v3  ;;  %v1551_v12 = vld [vmem:[%s1718_s1] ss:$0 sm:$0xff]  ;;  %s1466_s1 = smov 64   ;;  %v32_v61 = vld [vmem:[%s1717_s0 + $0x10] sm:$0xff] }
   0x4   :  { %1352 = vmatpush3.bf16.msra.mxu0 %v1519_v5  ;;  %1358 = vmatpush3.bf16.msra.mxu1 %v1519_v5  ;;  %v1557_v15 = vld [vmem:[%s1719_s3] ss:$0 sm:$0xff] }
   0x5   :  { %1353 = vmatprep.subr.bf16.mxu0 %v1461_v0  ;;  %1359 = vmatprep.subr.bf16.mxu1 %v1461_v0 }
   0x6   :  { %1412 = vset.pattern.permute.xlu1 %v1464_v7 }
   0x8   :  { %1355 = vmatpush3.bf16.msra.mxu0 %v1531_v9  ;;  %v117_v10 = vld [vmem:[#allocation3] sm:$0xff]  ;;  %1361 = vmatpush3.bf16.msra.mxu1 %v1531_v9 }
   0x9   :  { %v205_v11 = vld [vmem:[#allocation4] sm:$0xff]  ;;  %1362 = vmatprep.subr.bf16.mxu0 %v1461_v0  ;;  %1368 = vmatprep.subr.bf16.mxu1 %v1461_v0 }
   0xa   :  { %207 = vrot.lane.b32.xlu1 %v205_v11, %s1465_s2 }
   0xb   :  { %1260 = vmatmul.mubr.msk.f32.vlgmr.msra.gmra.mrb[0].mxu0 %vm27_vm0, %v117_v10 }
   0xc   :  { %1364 = vmatpush3.bf16.msra.mxu0 %v1519_v5  ;;  %1281 = vmatprep.mubr.msk.f32.mxu0 %vm1462_vm1, %v1463_v4 }
   0xd   :  { %1365 = vmatprep.subr.bf16.mxu0 %v1461_v0 }
  0x10   :  { %1367 = vmatpush3.bf16.msra.mxu0 %v1531_v9 }
  0x11   :  { %1374 = vmatprep.subr.bf16.mxu0 %v1461_v0 }
  0x7c   :  { %v208_v28 = vpop.permute.xlu1 %207 }
  0x82   :  { %v43_v13 = vpop.permute.xlu0 %42 }
  0x83   :  { %v86_v14 = vmul.f32 %v1551_v12, %v43_v13 }
  0x85   :  { %v100_v16 = vadd.f32 %v1557_v15, %v86_v14 }
  0xde   :  { %v192_v17 = vpop.f32.mrb[0].mxu0 }
  0xdf   :  { %v196_v18 = vadd.f32 %v192_v17, %v100_v16  ;;  %v1261_v19 = vpop.f32.mrb[1].mxu0 }
  0xe1   :  { %v1181_v20 = vmul.f32 -1.442695, %v196_v18 }
  0xe3   :  { %1413 = vpow2.f32 %v1181_v20 }
  0xed   :  { %v1414_v21 = vpop.eup %1413 }
  0xee   :  { %v200_v22 = vadd.f32 1.0, %v1414_v21 }
  0xf0   :  { %1415 = vrcp.f32 %v200_v22 }
  0xfa   :  { %v1416_v23 = vpop.eup %1415 }
  0xfb   :  { %v203_v24 = vmul.f32 2.0, %v1416_v23  ;;  %v210_v29 = vmul.f32 %v1416_v23, %v208_v28 }
  0xfd   :  { %v1182_v25 = vadd.f32 -1.0, %v203_v24 }
  0xff   :  { %212 = vrot.lane.b32.xlu0 %v1182_v25, %s1466_s1 }
 0x171   :  { %v213_v26 = vpop.permute.xlu0 %212 }
 0x172   :  { %v215_v27 = vmul.f32 %v1416_v23, %v213_v26 }
 0x174   :  { %217 = vrot.lane.b32.xlu1 %v215_v27, %s1465_s2  ;;  %v33_v27 = vld [vmem:[%s1717_s0 + $0x18] sm:$0xff] }
 0x1e6   :  { %v218_v30 = vpop.permute.xlu1 %217 }
 0x1e7   :  { %v220_v31 = vadd.f32 %v218_v30, %v210_v29 }
 0x1e9   :  { %1417 = vtanh.f32 %v220_v31 }
 0x1f3   :  { %v1418_v32 = vpop.eup %1417 }
 0x1f4   :  { %228 = vrot.lane.b32.xlu0 %v1418_v32, %s1466_s1 }
 0x1f8   :  { %47 = vperm.xlu0 %1411, %v31_v33  }
 0x266   :  { %v229_v34 = vpop.permute.xlu0 %228 }
 0x267   :  { %v231_v35 = vmul.f32 %v1416_v23, %v229_v34 }
 0x269   :  { %233 = vrot.lane.b32.xlu1 %v231_v35, %s1465_s2 }
 0x26d   :  { %222 = vrot.lane.b32.xlu1 %v220_v31, %s1467_s12 }
 0x277   :  { %v48_v40 = vpop.permute.xlu0 %47 }
 0x278   :  { %v87_v41 = vmul.f32 %v1551_v12, %v48_v40 }
 0x27a   :  { %v101_v42 = vadd.f32 %v1557_v15, %v87_v41 }
 0x2db   :  { %v234_v36 = vpop.permute.xlu1 %233 }
 0x2dc   :  { %236 = vst.msk [vmem:[#allocation3] sm:$0xff] %vm27_vm0, %v234_v36 }
 0x2df   :  { %v223_v37 = vpop.permute.xlu1 %222 }
 0x2e0   :  { %225 = vst.msk [vmem:[#allocation4] sm:$0xff] %vm27_vm0, %v223_v37 }
 0x2e3   :  { %v239_v38 = vld [vmem:[#allocation3] sm:$0xff] }
 0x2e4   :  { %1271 = vmatmul.mubr.msk.f32.vlgmr.msra.gmra.mrb[0].mxu1 %vm27_vm0, %v239_v38 }
 0x2e5   :  { %1370 = vmatpush3.bf16.msra.mxu1 %v1519_v5  ;;  %1292 = vmatprep.mubr.msk.f32.mxu1 %vm1462_vm1, %v1463_v4 }
 0x2e6   :  { %1371 = vmatprep.subr.bf16.mxu1 %v1461_v0 }
 0x2e7   :  { %v326_v39 = vld [vmem:[#allocation4] sm:$0xff] }
 0x2e8   :  { %328 = vrot.lane.b32.xlu1 %v326_v39, %s1465_s2 }
 0x2e9   :  { %1373 = vmatpush3.bf16.msra.mxu1 %v1531_v9 }
 0x2ea   :  { %1380 = vmatprep.subr.bf16.mxu1 %v1461_v0 }
 0x35a   :  { %v329_v54 = vpop.permute.xlu1 %328 }
 0x3b7   :  { %v313_v43 = vpop.f32.mrb[0].mxu1 }
 0x3b8   :  { %v317_v44 = vadd.f32 %v313_v43, %v101_v42  ;;  %v1272_v45 = vpop.f32.mrb[1].mxu1 }
 0x3ba   :  { %v1184_v46 = vmul.f32 -1.442695, %v317_v44 }
 0x3bc   :  { %1419 = vpow2.f32 %v1184_v46 }
 0x3c6   :  { %v1420_v47 = vpop.eup %1419 }
 0x3c7   :  { %v321_v48 = vadd.f32 1.0, %v1420_v47 }
 0x3c9   :  { %1421 = vrcp.f32 %v321_v48 }
 0x3d3   :  { %v1422_v49 = vpop.eup %1421 }
 0x3d4   :  { %v324_v50 = vmul.f32 2.0, %v1422_v49  ;;  %v331_v55 = vmul.f32 %v1422_v49, %v329_v54 }
 0x3d6   :  { %v1185_v51 = vadd.f32 -1.0, %v324_v50 }
 0x3d8   :  { %333 = vrot.lane.b32.xlu0 %v1185_v51, %s1466_s1 }
 0x44a   :  { %v334_v52 = vpop.permute.xlu0 %333 }
 0x44b   :  { %v336_v53 = vmul.f32 %v1422_v49, %v334_v52 }
 0x44d   :  { %338 = vrot.lane.b32.xlu0 %v336_v53, %s1465_s2  ;;  %v34_v53 = vld [vmem:[%s1717_s0 + $0x20] sm:$0xff] }
 0x4bf   :  { %v339_v56 = vpop.permute.xlu0 %338 }
 0x4c0   :  { %v341_v57 = vadd.f32 %v339_v56, %v331_v55 }
 0x4c2   :  { %1423 = vtanh.f32 %v341_v57 }
 0x4cc   :  { %v1424_v58 = vpop.eup %1423 }
 0x4cd   :  { %349 = vrot.lane.b32.xlu1 %v1424_v58, %s1466_s1 }
 0x4d1   :  { %52 = vperm.xlu1 %1412, %v32_v61  }
 0x53f   :  { %v350_v59 = vpop.permute.xlu1 %349 }
 0x540   :  { %v352_v60 = vmul.f32 %v1422_v49, %v350_v59 }
 0x542   :  { %354 = vrot.lane.b32.xlu0 %v352_v60, %s1465_s2 }
 0x546   :  { %343 = vrot.lane.b32.xlu0 %v341_v57, %s1467_s12 }
 0x550   :  { %v53_v3 = vpop.permute.xlu1 %52 }
 0x551   :  { %v88_v6 = vmul.f32 %v1551_v12, %v53_v3 }
 0x553   :  { %v102_v7 = vadd.f32 %v1557_v15, %v88_v6 }
 0x5b4   :  { %v355_v62 = vpop.permute.xlu0 %354 }
 0x5b5   :  { %357 = vst.msk [vmem:[#allocation3] sm:$0xff] %vm27_vm0, %v355_v62 }
 0x5b8   :  { %v344_v63 = vpop.permute.xlu0 %343 }
 0x5b9   :  { %346 = vst.msk [vmem:[#allocation4] sm:$0xff] %vm27_vm0, %v344_v63 }
 0x5bc   :  { %v360_v1 = vld [vmem:[#allocation3] sm:$0xff] }
 0x5bd   :  { %1282 = vmatmul.mubr.msk.f32.vlgmr.msra.gmra.mrb[2].mxu0 %vm27_vm0, %v360_v1 }
 0x5be   :  { %1376 = vmatpush3.bf16.msra.mxu0 %v1519_v5  ;;  %1303 = vmatprep.mubr.msk.f32.mxu0 %vm1462_vm1, %v1463_v4 }
 0x5bf   :  { %1377 = vmatprep.subr.bf16.mxu0 %v1461_v0 }
 0x5c0   :  { %v447_v2 = vld [vmem:[#allocation4] sm:$0xff] }
 0x5c1   :  { %449 = vrot.lane.b32.xlu0 %v447_v2, %s1465_s2 }
 0x5c2   :  { %1379 = vmatpush3.bf16.msra.mxu0 %v1531_v9 }
 0x5c3   :  { %1386 = vmatprep.subr.bf16.mxu0 %v1461_v0 }
 0x633   :  { %v450_v22 = vpop.permute.xlu0 %449 }
 0x690   :  { %v434_v8 = vpop.f32.mrb[2].mxu0 }
 0x691   :  { %v438_v10 = vadd.f32 %v434_v8, %v102_v7  ;;  %v1283_v11 = vpop.f32.mrb[3].mxu0 }
 0x693   :  { %v1187_v13 = vmul.f32 -1.442695, %v438_v10 }
 0x695   :  { %1425 = vpow2.f32 %v1187_v13 }
 0x69f   :  { %v1426_v14 = vpop.eup %1425 }
 0x6a0   :  { %v442_v16 = vadd.f32 1.0, %v1426_v14 }
 0x6a2   :  { %1427 = vrcp.f32 %v442_v16 }
 0x6ac   :  { %v1428_v17 = vpop.eup %1427 }
 0x6ad   :  { %v445_v18 = vmul.f32 2.0, %v1428_v17  ;;  %v452_v23 = vmul.f32 %v1428_v17, %v450_v22 }
 0x6af   :  { %v1188_v19 = vadd.f32 -1.0, %v445_v18 }
 0x6b1   :  { %454 = vrot.lane.b32.xlu1 %v1188_v19, %s1466_s1 }
 0x723   :  { %v455_v20 = vpop.permute.xlu1 %454 }
 0x724   :  { %v457_v21 = vmul.f32 %v1428_v17, %v455_v20 }
 0x726   :  { %459 = vrot.lane.b32.xlu1 %v457_v21, %s1465_s2  ;;  %v35_v21 = vld [vmem:[%s1717_s0 + $0x28] sm:$0xff] }
 0x798   :  { %v460_v24 = vpop.permute.xlu1 %459 }
 0x799   :  { %v462_v25 = vadd.f32 %v460_v24, %v452_v23 }
 0x79b   :  { %1429 = vtanh.f32 %v462_v25 }
 0x7a5   :  { %v1430_v26 = vpop.eup %1429 }
 0x7a6   :  { %470 = vrot.lane.b32.xlu0 %v1430_v26, %s1466_s1 }
 0x7aa   :  { %57 = vperm.xlu0 %1411, %v33_v27  }
 0x818   :  { %v471_v28 = vpop.permute.xlu0 %470 }
 0x819   :  { %v473_v29 = vmul.f32 %v1428_v17, %v471_v28 }
 0x81b   :  { %475 = vrot.lane.b32.xlu1 %v473_v29, %s1465_s2 }
 0x81f   :  { %464 = vrot.lane.b32.xlu1 %v462_v25, %s1467_s12 }
 0x829   :  { %v58_v34 = vpop.permute.xlu0 %57 }
 0x82a   :  { %v89_v35 = vmul.f32 %v1551_v12, %v58_v34 }
 0x82c   :  { %v103_v36 = vadd.f32 %v1557_v15, %v89_v35 }
 0x88d   :  { %v476_v30 = vpop.permute.xlu1 %475 }
 0x88e   :  { %478 = vst.msk [vmem:[#allocation3] sm:$0xff] %vm27_vm0, %v476_v30 }
 0x891   :  { %v465_v31 = vpop.permute.xlu1 %464 }
 0x892   :  { %467 = vst.msk [vmem:[#allocation4] sm:$0xff] %vm27_vm0, %v465_v31 }
 0x895   :  { %v481_v32 = vld [vmem:[#allocation3] sm:$0xff] }
 0x896   :  { %1293 = vmatmul.mubr.msk.f32.vlgmr.msra.gmra.mrb[2].mxu1 %vm27_vm0, %v481_v32 }
 0x897   :  { %1382 = vmatpush3.bf16.msra.mxu1 %v1519_v5  ;;  %1314 = vmatprep.mubr.msk.f32.mxu1 %vm1462_vm1, %v1463_v4 }
 0x898   :  { %1383 = vmatprep.subr.bf16.mxu1 %v1461_v0 }
 0x899   :  { %v568_v33 = vld [vmem:[#allocation4] sm:$0xff] }
 0x89a   :  { %570 = vrot.lane.b32.xlu1 %v568_v33, %s1465_s2 }
 0x89b   :  { %1385 = vmatpush3.bf16.msra.mxu1 %v1531_v9 }
 0x89c   :  { %1392 = vmatprep.subr.bf16.mxu1 %v1461_v0 }
 0x90c   :  { %v571_v48 = vpop.permute.xlu1 %570 }
 0x969   :  { %v555_v37 = vpop.f32.mrb[2].mxu1 }
 0x96a   :  { %v559_v38 = vadd.f32 %v555_v37, %v103_v36  ;;  %v1294_v39 = vpop.f32.mrb[3].mxu1 }
 0x96c   :  { %v1190_v40 = vmul.f32 -1.442695, %v559_v38 }
 0x96e   :  { %1431 = vpow2.f32 %v1190_v40 }
 0x978   :  { %v1432_v41 = vpop.eup %1431 }
 0x979   :  { %v563_v42 = vadd.f32 1.0, %v1432_v41 }
 0x97b   :  { %1433 = vrcp.f32 %v563_v42 }
 0x985   :  { %v1434_v43 = vpop.eup %1433 }
 0x986   :  { %v566_v44 = vmul.f32 2.0, %v1434_v43  ;;  %v573_v49 = vmul.f32 %v1434_v43, %v571_v48 }
 0x988   :  { %v1191_v45 = vadd.f32 -1.0, %v566_v44 }
 0x98a   :  { %575 = vrot.lane.b32.xlu0 %v1191_v45, %s1466_s1  ;;  %v36_v45 = vld [vmem:[%s1717_s0 + $0x30] sm:$0xff] }
 0x9fc   :  { %v576_v46 = vpop.permute.xlu0 %575 }
 0x9fd   :  { %v578_v47 = vmul.f32 %v1434_v43, %v576_v46 }
 0x9ff   :  { %580 = vrot.lane.b32.xlu0 %v578_v47, %s1465_s2 }
 0xa71   :  { %v581_v50 = vpop.permute.xlu0 %580 }
 0xa72   :  { %v583_v51 = vadd.f32 %v581_v50, %v573_v49 }
 0xa74   :  { %1435 = vtanh.f32 %v583_v51 }
 0xa7e   :  { %v1436_v52 = vpop.eup %1435 }
 0xa7f   :  { %591 = vrot.lane.b32.xlu1 %v1436_v52, %s1466_s1 }
 0xa83   :  { %62 = vperm.xlu1 %1412, %v34_v53  }
 0xaf1   :  { %v592_v54 = vpop.permute.xlu1 %591 }
 0xaf2   :  { %v594_v55 = vmul.f32 %v1434_v43, %v592_v54 }
 0xaf4   :  { %596 = vrot.lane.b32.xlu0 %v594_v55, %s1465_s2 }
 0xaf8   :  { %585 = vrot.lane.b32.xlu0 %v583_v51, %s1467_s12 }
 0xb02   :  { %v63_v60 = vpop.permute.xlu1 %62 }
 0xb03   :  { %v90_v61 = vmul.f32 %v1551_v12, %v63_v60 }
 0xb05   :  { %v104_v62 = vadd.f32 %v1557_v15, %v90_v61 }
 0xb66   :  { %v597_v56 = vpop.permute.xlu0 %596 }
 0xb67   :  { %599 = vst.msk [vmem:[#allocation3] sm:$0xff] %vm27_vm0, %v597_v56 }
 0xb6a   :  { %v586_v57 = vpop.permute.xlu0 %585 }
 0xb6b   :  { %588 = vst.msk [vmem:[#allocation4] sm:$0xff] %vm27_vm0, %v586_v57 }
 0xb6e   :  { %v602_v58 = vld [vmem:[#allocation3] sm:$0xff] }
 0xb6f   :  { %1304 = vmatmul.mubr.msk.f32.vlgmr.msra.gmra.mrb[4].mxu0 %vm27_vm0, %v602_v58 }
 0xb70   :  { %1388 = vmatpush3.bf16.msra.mxu0 %v1519_v5  ;;  %1325 = vmatprep.mubr.msk.f32.mxu0 %vm1462_vm1, %v1463_v4 }
 0xb71   :  { %1389 = vmatprep.subr.bf16.mxu0 %v1461_v0 }
 0xb72   :  { %v689_v59 = vld [vmem:[#allocation4] sm:$0xff] }
 0xb73   :  { %691 = vrot.lane.b32.xlu0 %v689_v59, %s1465_s2 }
 0xb74   :  { %1391 = vmatpush3.bf16.msra.mxu0 %v1531_v9 }
 0xb75   :  { %1398 = vmatprep.subr.bf16.mxu0 %v1461_v0 }
 0xbe5   :  { %v692_v16 = vpop.permute.xlu0 %691 }
 0xc42   :  { %v676_v63 = vpop.f32.mrb[4].mxu0 }
 0xc43   :  { %v680_v1 = vadd.f32 %v676_v63, %v104_v62  ;;  %v1305_v2 = vpop.f32.mrb[5].mxu0 }
 0xc45   :  { %v1193_v3 = vmul.f32 -1.442695, %v680_v1 }
 0xc47   :  { %1437 = vpow2.f32 %v1193_v3 }
 0xc51   :  { %v1438_v6 = vpop.eup %1437 }
 0xc52   :  { %v684_v7 = vadd.f32 1.0, %v1438_v6 }
 0xc54   :  { %1439 = vrcp.f32 %v684_v7 }
 0xc5e   :  { %v1440_v8 = vpop.eup %1439 }
 0xc5f   :  { %v687_v10 = vmul.f32 2.0, %v1440_v8  ;;  %v694_v17 = vmul.f32 %v1440_v8, %v692_v16 }
 0xc61   :  { %v1194_v11 = vadd.f32 -1.0, %v687_v10  ;;  %v37_v10 = vld [vmem:[%s1717_s0 + $0x38] sm:$0xff] }
 0xc63   :  { %696 = vrot.lane.b32.xlu1 %v1194_v11, %s1466_s1 }
 0xcd5   :  { %v697_v13 = vpop.permute.xlu1 %696 }
 0xcd6   :  { %v699_v14 = vmul.f32 %v1440_v8, %v697_v13 }
 0xcd8   :  { %701 = vrot.lane.b32.xlu1 %v699_v14, %s1465_s2 }
 0xd4a   :  { %v702_v18 = vpop.permute.xlu1 %701 }
 0xd4b   :  { %v704_v19 = vadd.f32 %v702_v18, %v694_v17 }
 0xd4d   :  { %1441 = vtanh.f32 %v704_v19 }
 0xd57   :  { %v1442_v20 = vpop.eup %1441 }
 0xd58   :  { %712 = vrot.lane.b32.xlu0 %v1442_v20, %s1466_s1 }
 0xd5c   :  { %67 = vperm.xlu0 %1411, %v35_v21  }
 0xdca   :  { %v713_v22 = vpop.permute.xlu0 %712 }
 0xdcb   :  { %v715_v23 = vmul.f32 %v1440_v8, %v713_v22 }
 0xdcd   :  { %717 = vrot.lane.b32.xlu1 %v715_v23, %s1465_s2 }
 0xdd1   :  { %706 = vrot.lane.b32.xlu1 %v704_v19, %s1467_s12 }
 0xddb   :  { %v68_v28 = vpop.permute.xlu0 %67 }
 0xddc   :  { %v91_v29 = vmul.f32 %v1551_v12, %v68_v28 }
 0xdde   :  { %v105_v30 = vadd.f32 %v1557_v15, %v91_v29 }
 0xe3f   :  { %v718_v24 = vpop.permute.xlu1 %717 }
 0xe40   :  { %720 = vst.msk [vmem:[#allocation3] sm:$0xff] %vm27_vm0, %v718_v24 }
 0xe43   :  { %v707_v25 = vpop.permute.xlu1 %706 }
 0xe44   :  { %709 = vst.msk [vmem:[#allocation4] sm:$0xff] %vm27_vm0, %v707_v25 }
 0xe47   :  { %v723_v26 = vld [vmem:[#allocation3] sm:$0xff] }
 0xe48   :  { %1315 = vmatmul.mubr.msk.f32.vlgmr.msra.gmra.mrb[4].mxu1 %vm27_vm0, %v723_v26 }
 0xe49   :  { %1394 = vmatpush3.bf16.msra.mxu1 %v1519_v5  ;;  %1336 = vmatprep.mubr.msk.f32.mxu1 %vm1462_vm1, %v1463_v4 }
 0xe4a   :  { %1395 = vmatprep.subr.bf16.mxu1 %v1461_v0 }
 0xe4b   :  { %v810_v27 = vld [vmem:[#allocation4] sm:$0xff] }
 0xe4c   :  { %812 = vrot.lane.b32.xlu1 %v810_v27, %s1465_s2 }
 0xe4d   :  { %1397 = vmatpush3.bf16.msra.mxu1 %v1531_v9 }
 0xebe   :  { %v813_v40 = vpop.permute.xlu1 %812 }
 0xf1b   :  { %v797_v31 = vpop.f32.mrb[4].mxu1 }
 0xf1c   :  { %v801_v32 = vadd.f32 %v797_v31, %v105_v30  ;;  %v1316_v33 = vpop.f32.mrb[5].mxu1 }
 0xf1e   :  { %v1196_v34 = vmul.f32 -1.442695, %v801_v32 }
 0xf20   :  { %1443 = vpow2.f32 %v1196_v34 }
 0xf2a   :  { %v1444_v5 = vpop.eup %1443 }
 0xf2b   :  { %v805_v35 = vadd.f32 1.0, %v1444_v5 }
 0xf2d   :  { %1445 = vrcp.f32 %v805_v35  ;;  %v1088_v35 = vld [vmem:[%s1720_s4] sm:$0xff] }
 0xf37   :  { %v1446_v36 = vpop.eup %1445 }
 0xf38   :  { %v808_v37 = vmul.f32 2.0, %v1446_v36  ;;  %v815_v41 = vmul.f32 %v1446_v36, %v813_v40 }
 0xf3a   :  { %v1197_v38 = vadd.f32 -1.0, %v808_v37 }
 0xf3c   :  { %817 = vrot.lane.b32.xlu0 %v1197_v38, %s1466_s1  ;;  %v1090_v38 = vld [vmem:[%s1720_s4 + $0x10] sm:$0xff] }
 0xfae   :  { %v818_v39 = vpop.permute.xlu0 %817 }
 0xfaf   :  { %v820_v9 = vmul.f32 %v1446_v36, %v818_v39  ;;  %v1091_v39 = vld [vmem:[%s1720_s4 + $0x18] sm:$0xff] }
 0xfb1   :  { %822 = vrot.lane.b32.xlu0 %v820_v9, %s1465_s2  ;;  %v1402_v9 = vpack.c.bf16 %v1091_v39, %v1090_v38 }
0x1023   :  { %v823_v42 = vpop.permute.xlu0 %822 }
0x1024   :  { %v825_v43 = vadd.f32 %v823_v42, %v815_v41 }
0x1026   :  { %1447 = vtanh.f32 %v825_v43 }
0x1030   :  { %v1448_v44 = vpop.eup %1447 }
0x1031   :  { %833 = vrot.lane.b32.xlu1 %v1448_v44, %s1466_s1 }
0x1035   :  { %72 = vperm.xlu1 %1412, %v36_v45   ;;  %v1204_v45 = vld [vmem:[%s1721_s5] ss:$0 sm:$0xff] }
0x10a3   :  { %v834_v46 = vpop.permute.xlu1 %833 }
0x10a4   :  { %v836_v47 = vmul.f32 %v1446_v36, %v834_v46  ;;  %v1089_v36 = vld [vmem:[%s1720_s4 + $0x8] sm:$0xff] }
0x10a5   :  { %v1399_v37 = vpack.c.bf16 %v1089_v36, %v1088_v35 }
0x10a6   :  { %838 = vrot.lane.b32.xlu0 %v836_v47, %s1465_s2 }
0x10aa   :  { %827 = vrot.lane.b32.xlu0 %v825_v43, %s1467_s12 }
0x10b4   :  { %v73_v52 = vpop.permute.xlu1 %72 }
0x10b5   :  { %v92_v53 = vmul.f32 %v1551_v12, %v73_v52 }
0x10b7   :  { %v106_v54 = vadd.f32 %v1557_v15, %v92_v53 }
0x1118   :  { %v839_v48 = vpop.permute.xlu0 %838 }
0x1119   :  { %841 = vst.msk [vmem:[#allocation3] sm:$0xff] %vm27_vm0, %v839_v48 }
0x111c   :  { %v828_v49 = vpop.permute.xlu0 %827 }
0x111d   :  { %830 = vst.msk [vmem:[#allocation4] sm:$0xff] %vm27_vm0, %v828_v49 }
0x1120   :  { %v844_v50 = vld [vmem:[#allocation3] sm:$0xff] }
0x1121   :  { %1326 = vmatmul.mubr.msk.f32.vlgmr.msra.gmra.mrb[6].mxu0 %vm27_vm0, %v844_v50 }
0x1122   :  { %1347 = vmatprep.mubr.msk.f32.mxu0 %vm1462_vm1, %v1463_v4  ;;  %1400 = vmatpush3.bf16.msra.mxu0 %v1399_v37 }
0x1123   :  { %1401 = vmatprep.subr.bf16.mxu0 %v1461_v0 }
0x1124   :  { %v931_v51 = vld [vmem:[#allocation4] sm:$0xff] }
0x1125   :  { %933 = vrot.lane.b32.xlu0 %v931_v51, %s1465_s2 }
0x1126   :  { %1403 = vmatpush3.bf16.msra.mxu0 %v1402_v9 }
0x1197   :  { %v934_v2 = vpop.permute.xlu0 %933 }
0x11f4   :  { %v918_v55 = vpop.f32.mrb[6].mxu0 }
0x11f5   :  { %v922_v56 = vadd.f32 %v918_v55, %v106_v54  ;;  %v1327_v57 = vpop.f32.mrb[7].mxu0 }
0x11f7   :  { %v1199_v58 = vmul.f32 -1.442695, %v922_v56 }
0x11f9   :  { %1449 = vpow2.f32 %v1199_v58 }
0x1203   :  { %v1450_v59 = vpop.eup %1449 }
0x1204   :  { %v926_v60 = vadd.f32 1.0, %v1450_v59 }
0x1206   :  { %1451 = vrcp.f32 %v926_v60 }
0x1210   :  { %v1452_v61 = vpop.eup %1451 }
0x1211   :  { %v929_v62 = vmul.f32 2.0, %v1452_v61  ;;  %v936_v3 = vmul.f32 %v1452_v61, %v934_v2 }
0x1213   :  { %v1200_v63 = vadd.f32 -1.0, %v929_v62 }
0x1215   :  { %938 = vrot.lane.b32.xlu1 %v1200_v63, %s1466_s1 }
0x1287   :  { %v939_v4 = vpop.permute.xlu1 %938 }
0x1288   :  { %v941_v1 = vmul.f32 %v1452_v61, %v939_v4 }
0x128a   :  { %943 = vrot.lane.b32.xlu1 %v941_v1, %s1465_s2 }
0x12fc   :  { %v944_v6 = vpop.permute.xlu1 %943 }
0x12fd   :  { %v946_v7 = vadd.f32 %v944_v6, %v936_v3 }
0x12ff   :  { %1453 = vtanh.f32 %v946_v7 }
0x1309   :  { %v1454_v8 = vpop.eup %1453 }
0x130a   :  { %954 = vrot.lane.b32.xlu0 %v1454_v8, %s1466_s1 }
0x130e   :  { %77 = vperm.xlu0 %1411, %v37_v10  }
0x137c   :  { %v955_v11 = vpop.permute.xlu0 %954 }
0x137d   :  { %v957_v13 = vmul.f32 %v1452_v61, %v955_v11 }
0x137f   :  { %959 = vrot.lane.b32.xlu1 %v957_v13, %s1465_s2 }
0x1383   :  { %948 = vrot.lane.b32.xlu1 %v946_v7, %s1467_s12 }
0x138d   :  { %v78_v19 = vpop.permute.xlu0 %77 }
0x138e   :  { %v93_v20 = vmul.f32 %v1551_v12, %v78_v19 }
0x1390   :  { %v107_v21 = vadd.f32 %v1557_v15, %v93_v20 }
0x13f1   :  { %v960_v14 = vpop.permute.xlu1 %959 }
0x13f2   :  { %962 = vst.msk [vmem:[#allocation3] sm:$0xff] %vm27_vm0, %v960_v14 }
0x13f5   :  { %v949_v16 = vpop.permute.xlu1 %948 }
0x13f6   :  { %951 = vst.msk [vmem:[#allocation4] sm:$0xff] %vm27_vm0, %v949_v16 }
0x13f9   :  { %v965_v17 = vld [vmem:[#allocation3] sm:$0xff] }
0x13fa   :  { %1337 = vmatmul.mubr.msk.f32.vlgmr.msra.gmra.mrb[6].mxu1 %vm27_vm0, %v965_v17 }
0x13fd   :  { %v1052_v18 = vld [vmem:[#allocation4] sm:$0xff] }
0x13fe   :  { %1054 = vrot.lane.b32.xlu1 %v1052_v18, %s1465_s2 }
0x1470   :  { %v1055_v12 = vpop.permute.xlu1 %1054 }
0x14cd   :  { %v1039_v22 = vpop.f32.mrb[6].mxu1 }
0x14ce   :  { %v1043_v23 = vadd.f32 %v1039_v22, %v107_v21  ;;  %v1338_v24 = vpop.f32.mrb[7].mxu1 }
0x14d0   :  { %v1202_v25 = vmul.f32 -1.442695, %v1043_v23 }
0x14d2   :  { %1455 = vpow2.f32 %v1202_v25 }
0x14dc   :  { %v1456_v26 = vpop.eup %1455 }
0x14dd   :  { %v1047_v27 = vadd.f32 1.0, %v1456_v26 }
0x14df   :  { %1457 = vrcp.f32 %v1047_v27 }
0x14e9   :  { %v1458_v28 = vpop.eup %1457 }
0x14ea   :  { %v1050_v29 = vmul.f32 2.0, %v1458_v28  ;;  %v1057_v33 = vmul.f32 %v1458_v28, %v1055_v12 }
0x14ec   :  { %v1203_v30 = vadd.f32 -1.0, %v1050_v29 }
0x14ee   :  { %1059 = vrot.lane.b32.xlu0 %v1203_v30, %s1466_s1 }
0x1560   :  { %v1060_v31 = vpop.permute.xlu0 %1059 }
0x1561   :  { %v1062_v32 = vmul.f32 %v1458_v28, %v1060_v31 }
0x1563   :  { %1064 = vrot.lane.b32.xlu0 %v1062_v32, %s1465_s2 }
0x15d5   :  { %v1065_v15 = vpop.permute.xlu0 %1064 }
0x15d6   :  { %v1067_v34 = vadd.f32 %v1065_v15, %v1057_v33 }
0x15d8   :  { %1459 = vtanh.f32 %v1067_v34 }
0x15e2   :  { %v1460_v5 = vpop.eup %1459 }
0x15e3   :  { %1075 = vrot.lane.b32.xlu1 %v1460_v5, %s1466_s1 }
0x15e7   :  { %1069 = vrot.lane.b32.xlu1 %v1067_v34, %s1467_s12 }
0x1655   :  { %v1076_v40 = vpop.permute.xlu1 %1075 }
0x1656   :  { %v1078_v41 = vmul.f32 %v1458_v28, %v1076_v40 }
0x1658   :  { %1080 = vrot.lane.b32.xlu0 %v1078_v41, %s1465_s2 }
0x1659   :  { %v1070_v42 = vpop.permute.xlu1 %1069 }
0x165a   :  { %1072 = vst.msk [vmem:[#allocation4] sm:$0xff] %vm27_vm0, %v1070_v42 }
0x16ca   :  { %v1081_v43 = vpop.permute.xlu0 %1080 }
0x16cb   :  { %1083 = vst.msk [vmem:[#allocation3] sm:$0xff] %vm27_vm0, %v1081_v43 }
0x16d2   :  { %v1087_v44 = vld [vmem:[#allocation3] sm:$0xff] }
0x16d3   :  { %1348 = vmatmul.mubr.msk.f32.vlgmr.msra.gmra.mrb[8].mxu0 %vm27_vm0, %v1087_v44 }
0x17a6   :  { %v1168_v46 = vpop.f32.mrb[8].mxu0 }
0x17a7   :  { %v1169_v0 = vadd.f32 %v1204_v45, %v1168_v46  ;;  %v1349_v47 = vpop.f32.mrb[9].mxu0 }
0x17a9   :  { %1173 = vst.msk [vmem:[%s1722_s6] sm:$0xff] %vm1172_vm2, %v1169_v0 }

</bundles_post_ra>
